<compile_context>
chip_gen: v7x
topology: tpu7x:2x2x1
jax: 0.10.0
libtpu: 0.0.40
codegen_flags: <defaults>
</compile_context>

<pallas_src>
import jax
import jax.numpy as jnp
from jax.experimental import pallas as pl
from jax.experimental.pallas import tpu as pltpu

ALPHA = 0.5
BETA = 0.3
EPS = 1e-6


def _make_kernel(T, D, tb, alpha, beta):
    TD = T * D
    n_valid = (T - 1) * D              # valid gradient elements per sample
    mse_scale = 1.0 / (T * D)
    rel_scale = alpha / (T * D)
    grad_scale = beta / n_valid

    def kernel(pred_ref, target_ref, out_ref):
        pred = pred_ref[...]           # (tb, T*D) f32, samples on sublanes
        target = target_ref[...]       # (tb, T*D) f32
        diff = pred - target

        # Relative error with an exact divide (parity with the PyTorch module;
        # the divide rides the EUP and is fully hidden at these sizes).
        rel = jnp.abs(diff) / (jnp.abs(target) + EPS)

        # Along-T gradient in the flattened layout: lane l = t*D + d, so
        # diff[t+1, d] - diff[t, d] == diff[l + D] - diff[l].  A lane roll by
        # (TD - D) on the XLU brings lane l+D to lane l; lanes >= (T-1)*D are
        # the wrapped tail and are masked to exactly zero.
        shifted = pltpu.roll(diff, shift=TD - D, axis=1)
        lane = jax.lax.broadcasted_iota(jnp.int32, (tb, TD), 1)
        dgrad = jnp.where(lane < n_valid, shifted - diff, 0.0)

        combined = (
            (diff * diff) * mse_scale
            + rel * rel_scale
            + (dgrad * dgrad) * grad_scale
        )
        # One fused reduction per sample; one vector store per tile.
        out_ref[...] = jnp.sum(combined, axis=1, keepdims=True)

    return kernel


def _round_up(x, m):
    return ((x + m - 1) // m) * m


def gradient_aware_loss(pred, target, alpha=ALPHA, beta=BETA):
    """GradientAwareLoss forward.

    pred/target: (T, D)    -> scalar loss (exact PyTorch module semantics), or
                 (B, T, D) -> (B,) per-sample losses (vmapped module).
    """
    assert pred.shape == target.shape, (pred.shape, target.shape)
    squeeze = pred.ndim == 2
    if squeeze:
        pred, target = pred[None], target[None]
    assert pred.ndim == 3, "expected (T, D) or (B, T, D)"
    B, T, D = pred.shape
    assert T >= 2, "gradient term needs at least 2 time steps"
    TD = T * D

    # Free reshape: each sample becomes one lane-dense row of length T*D.
    pred2 = pred.reshape(B, TD).astype(jnp.float32)
    target2 = target.reshape(B, TD).astype(jnp.float32)

    # --- tile (TB) selection -------------------------------------------------
    # Double-buffered pred+target per step: 2 inputs * 2 buffers * tb*TD*4 B.
    # Keep it <= ~40 MiB so double buffering survives on v7x's 64 MiB VMEM;
    # v5e/v6e (128 MiB physical) are comfortably inside the same cap.
    vmem_budget = 40 * 1024 * 1024
    tb_vmem = max(8, (vmem_budget // (16 * TD)) // 8 * 8)
    tb_cap = min(1024, tb_vmem)

    B8 = _round_up(B, 8)
    if B8 >= 2 * tb_cap:
        tb = tb_cap                          # plenty of work: full-size tiles
    elif B8 >= 16:
        tb = _round_up((B8 + 1) // 2, 8)     # >=2 grid steps so v7x uses both TCs
    else:
        tb = B8                              # tiny batch: single block
    B_pad = _round_up(B8, tb)
    num_blocks = B_pad // tb

    if B_pad != B:
        # Padded rows are all zeros -> every loss term is exactly 0; sliced off.
        pred2 = jnp.pad(pred2, ((0, B_pad - B), (0, 0)))
        target2 = jnp.pad(target2, ((0, B_pad - B), (0, 0)))

    kernel = _make_kernel(T, D, tb, float(alpha), float(beta))

    cost = pl.CostEstimate(
        flops=int(12 * B_pad * TD),            # elementwise only; no matmul
        transcendentals=int(B_pad * TD),       # one f32 divide per element
        bytes_accessed=int((2 * B_pad * TD + B_pad) * 4),
    )

    vmem_limit = int(min(100 * 1024 * 1024,
                         max(32 * 1024 * 1024, 2 * 16 * tb * TD)))

    out = pl.pallas_call(
        kernel,
        out_shape=jax.ShapeDtypeStruct((B_pad, 1), jnp.float32),
        grid=(num_blocks,),
        in_specs=[
            pl.BlockSpec((tb, TD), lambda g: (g, 0)),   # pred rows
            pl.BlockSpec((tb, TD), lambda g: (g, 0)),   # target rows
        ],
        out_specs=pl.BlockSpec((tb, 1), lambda g: (g, 0)),
        compiler_params=pltpu.CompilerParams(
            dimension_semantics=("parallel",),          # batch axis across TCs (v7x)
            vmem_limit_bytes=vmem_limit,
        ),
        cost_estimate=cost,
    )(pred2, target2)

    losses = out.reshape(B_pad)[:B]
    return losses[0] if squeeze else losses


def _reference_loss(pred, target, alpha=ALPHA, beta=BETA):
    diff = pred - target
    mse = jnp.mean(diff * diff)
    rel = jnp.mean(jnp.abs(diff) / (jnp.abs(target) + EPS))
    dgrad = diff[1:] - diff[:-1]
    grad_mse = jnp.mean(dgrad * dgrad)
    return mse + alpha * rel + beta * grad_mse


if __name__ == "__main__":
    key = jax.random.PRNGKey(0)
    k1, k2 = jax.random.split(key)

    B, T, D = 2, 8, 32   # batch=2, seq_len=8, features=32
    pred = jax.random.normal(k1, (B, T, D), dtype=jnp.float32)
    target = jax.random.normal(k2, (B, T, D), dtype=jnp.float32)

    # Batched path: one pallas_call for the whole batch.
    losses = jax.block_until_ready(gradient_aware_loss(pred, target))
    ref = jax.block_until_ready(jax.vmap(_reference_loss)(pred, target))
    assert losses.shape == (B,), losses.shape
    assert jnp.allclose(losses, ref, rtol=1e-4, atol=1e-5), (losses, ref)

    # Single-sample path (exact module semantics: scalar output).
    single = jax.block_until_ready(gradient_aware_loss(pred[0], target[0]))
    assert jnp.allclose(single, ref[0], rtol=1e-4, atol=1e-5), (single, ref[0])

    print("KERNEL_OK")
</pallas_src>

<mosaic_0001>
module attributes {stable_mosaic.version = 11 : i64} {
  func.func @kernel(%arg0: i32, %arg1: memref<8x256xf32, #tpu.memory_space<vmem>>, %arg2: memref<8x256xf32, #tpu.memory_space<vmem>>, %arg3: memref<8x1xf32, #tpu.memory_space<vmem>>) attributes {dimension_semantics = [#tpu.dimension_semantics<parallel>], iteration_bounds = array<i64: 1>, scalar_prefetch = 0 : i64, scratch_operands = 0 : i64, tpu.core_type = #tpu.core_type<tc>, window_params = [{transform_indices = @transform_0, window_bounds = array<i64: 8, 256>}, {transform_indices = @transform_1, window_bounds = array<i64: 8, 256>}, {transform_indices = @transform_2, window_bounds = array<i64: 8, 1>}]} {
    %c0 = arith.constant 0 : index
    %c0_0 = arith.constant 0 : index
    %0 = vector.load %arg1[%c0, %c0_0] : memref<8x256xf32, #tpu.memory_space<vmem>>, vector<8x256xf32>
    %c0_1 = arith.constant 0 : index
    %c0_2 = arith.constant 0 : index
    %1 = vector.load %arg2[%c0_1, %c0_2] : memref<8x256xf32, #tpu.memory_space<vmem>>, vector<8x256xf32>
    %2 = arith.subf %0, %1 : vector<8x256xf32>
    %3 = math.absf %2 : vector<8x256xf32>
    %4 = math.absf %1 : vector<8x256xf32>
    %cst = arith.constant 9.99999997E-7 : f32
    %5 = vector.broadcast %cst : f32 to vector<8x256xf32>
    %6 = arith.addf %4, %5 : vector<8x256xf32>
    %7 = arith.divf %3, %6 : vector<8x256xf32>
    %c224_i32 = arith.constant 224 : i32
    %8 = tpu.dynamic_rotate %2 by %c224_i32 dim 1 : vector<8x256xf32>, i32 -> vector<8x256xf32>
    %9 = tpu.iota {dimensions = array<i32: 1>} : vector<8x256xi32>
    %c224_i32_3 = arith.constant 224 : i32
    %10 = vector.broadcast %c224_i32_3 : i32 to vector<8x256xi32>
    %11 = arith.cmpi slt, %9, %10 : vector<8x256xi32>
    %12 = arith.subf %8, %2 : vector<8x256xf32>
    %cst_4 = arith.constant 0.000000e+00 : f32
    %13 = vector.broadcast %cst_4 : f32 to vector<8x256xf32>
    %14 = arith.select %11, %12, %13 : vector<8x256xi1>, vector<8x256xf32>
    %15 = arith.mulf %2, %2 : vector<8x256xf32>
    %cst_5 = arith.constant 3.906250e-03 : f32
    %16 = vector.broadcast %cst_5 : f32 to vector<8x256xf32>
    %17 = arith.mulf %15, %16 : vector<8x256xf32>
    %cst_6 = arith.constant 0.001953125 : f32
    %18 = vector.broadcast %cst_6 : f32 to vector<8x256xf32>
    %19 = arith.mulf %7, %18 : vector<8x256xf32>
    %20 = arith.addf %17, %19 : vector<8x256xf32>
    %21 = arith.mulf %14, %14 : vector<8x256xf32>
    %cst_7 = arith.constant 0.00133928575 : f32
    %22 = vector.broadcast %cst_7 : f32 to vector<8x256xf32>
    %23 = arith.mulf %21, %22 : vector<8x256xf32>
    %24 = arith.addf %20, %23 : vector<8x256xf32>
    %cst_8 = arith.constant dense<0.000000e+00> : vector<8xf32>
    %25 = vector.multi_reduction <add>, %24, %cst_8 [1] : vector<8x256xf32> to vector<8xf32>
    %26 = vector.shape_cast %25 : vector<8xf32> to vector<8x1xf32>
    %c0_9 = arith.constant 0 : index
    %c0_10 = arith.constant 0 : index
    %27 = vector.load %arg3[%c0_9, %c0_10] : memref<8x1xf32, #tpu.memory_space<vmem>>, vector<8x1xf32>
    tpu.vector_store %arg3[%c0_9, %c0_10], %26 {strides = array<i32>} : memref<8x1xf32, #tpu.memory_space<vmem>>, vector<8x1xf32>,
    return
  }
  func.func @transform_0(%arg0: i32) -> (i32, i32) {
    %c0_i32 = arith.constant 0 : i32
    %c0_i32_0 = arith.constant 0 : i32
    return %arg0, %c0_i32 : i32, i32
  }
  func.func @transform_1(%arg0: i32) -> (i32, i32) {
    %c0_i32 = arith.constant 0 : i32
    %c0_i32_0 = arith.constant 0 : i32
    return %arg0, %c0_i32 : i32, i32
  }
  func.func @transform_2(%arg0: i32) -> (i32, i32) {
    %c0_i32 = arith.constant 0 : i32
    %c0_i32_0 = arith.constant 0 : i32
    return %arg0, %c0_i32 : i32, i32
  }
}

</mosaic_0001>

<bundles_post_ra>
// kernel: tpu_custom_call.1
= control target key start
LH: loop header
LB: loop body
LE: loop exit
PB: predicated region body
PF: predicated region fallthrough
CT: control target
= control target key end

     0   :  { %7 = vsyncpa [#allocation3], 0  ;;  %s192_s0 = inlined_call_operand.hbm [shape: f32[8,256], index: 0, kind: input, shape index: {}]   ;;  %s193_s1 = inlined_call_operand.hbm [shape: f32[8,256], index: 1, kind: input, shape index: {}]   ;;  %s194_s2 = inlined_call_operand.vmem [shape: f32[8,1], index: 2, kind: output, shape index: {}]  }
   0x1   :  { %8 = vsyncpa [#allocation5], 0  ;;  %s147_s9 = smov [#allocation2]   ;;  %s148_s11 = smov [#allocation4]  }
   0x2   :  { %s15_s10 = sshll.u32 %s147_s9, 4  ;;  %s25_s12 = sshll.u32 %s148_s11, 4  ;;  %s16_s10 = int_to_ptr.vmem [resolvable:$true] %s15_s10  ;;  %s26_s12 = int_to_ptr.vmem [resolvable:$true] %s25_s12 }
   0x3   :  { %s99_s15 = scalar_lea.hbm %s192_s0, 256 }
   0x4   :  { %p100_p0 = scmp.ne.s32.totalorder %s192_s0, %s99_s15  ;;  %p103_p1 = scmp.lt.u32.totalorder %s99_s15, %s192_s0 }
   0x6   :  { %p105_p2 = pnand %p103_p1, %p100_p0 }
   0x8   :  { %108 = shalt.err (!%p105_p2)
}
   0x9   :  { %s109_s20 = scalar_lea.vmem %s16_s10, 256  ;;  %p114_p4 = scmp.lt.s32.totalorder %s16_s10, %s16_s10 }
   0xa   :  { %p110_p3 = scmp.ne.s32.totalorder %s16_s10, %s109_s20  ;;  %p115_p5 = scmp.lt.s32.totalorder %s109_s20, %s109_s20 }
   0xc   :  { %p116_p6 = por %p115_p5, %p114_p4 }
   0xe   :  { %p117_p7 = pnand %p116_p6, %p110_p3 }
  0x10   :  { %120 = shalt.err (!%p117_p7)
}
  0x11   :  { %18 = dma.hbm_to_vmem [thread:$0]  %s192_s0, 256, %s16_s10, [#allocation3]  }
  0x12   :  { %s121_s25 = scalar_lea.hbm %s193_s1, 256 }
  0x13   :  { %p122_p8 = scmp.ne.s32.totalorder %s193_s1, %s121_s25  ;;  %p125_p9 = scmp.lt.u32.totalorder %s121_s25, %s193_s1 }
  0x15   :  { %p127_p10 = pnand %p125_p9, %p122_p8 }
  0x17   :  { %130 = shalt.err (!%p127_p10)
}
  0x18   :  { %s131_s30 = scalar_lea.vmem %s26_s12, 256  ;;  %p136_p12 = scmp.lt.s32.totalorder %s26_s12, %s26_s12 }
  0x19   :  { %p132_p11 = scmp.ne.s32.totalorder %s26_s12, %s131_s30  ;;  %p137_p13 = scmp.lt.s32.totalorder %s131_s30, %s131_s30 }
  0x1b   :  { %p138_p0 = por %p137_p13, %p136_p12 }
  0x1d   :  { %p139_p1 = pnand %p138_p0, %p132_p11 }
  0x1f   :  { %142 = shalt.err (!%p139_p1)
}
  0x20   :  { %28 = dma.hbm_to_vmem [thread:$0]  %s193_s1, 256, %s26_s12, [#allocation5]  }
  0x21   :  { %143 = dma.done.wait [#allocation3], 256  }
  0x22   :  { %144 = vsyncadd [#allocation3], 4294967040 }
  0x23   :  { %145 = dma.done.wait [#allocation5], 256  }
  0x24   :  { %146 = vsyncadd [#allocation5], 4294967040  ;;  %v35_v0 = vld [vmem:[#allocation2] sm:$0xff]  ;;  %v37_v1 = vld [vmem:[#allocation4] sm:$0xff]  ;;  %s149_s4 = smov 96   ;;  %v55_v10 = vlaneseq  ;;  %vm84_vm2 = vcmask 7168  }
  0x25   :  { %v36_v2 = vld [vmem:[#allocation2 + $0x8] sm:$0xff]  ;;  %v39_v3 = vsub.f32 %v35_v0, %v37_v1  ;;  %v38_v4 = vld [vmem:[#allocation4 + $0x8] sm:$0xff]  ;;  %v43_v6 = vand.u32 2147483647, %v37_v1 }
  0x26   :  { %v40_v5 = vsub.f32 %v36_v2, %v38_v4  ;;  %v44_v7 = vand.u32 2147483647, %v38_v4  ;;  %v56_v11 = vand.u32 127, %v55_v10 }
  0x27   :  { %51 = vrot.lane.b32.xlu0 %v39_v3, %s149_s4  ;;  %v45_v8 = vadd.f32 1e-06, %v43_v6  ;;  %v41_v12 = vand.u32 2147483647, %v39_v3  ;;  %v67_v19 = vmul.f32 %v39_v3, %v39_v3 }
  0x28   :  { %v46_v9 = vadd.f32 1e-06, %v44_v7  ;;  %v42_v14 = vand.u32 2147483647, %v40_v5  ;;  %v60_v18 = vadd.s32 128, %v56_v11  ;;  %v68_v21 = vmul.f32 %v40_v5, %v40_v5 }
  0x29   :  { %95 = vrcp.f32 %v45_v8  ;;  %vm57_vm0 = vcmp.lt.s32.totalorder %v56_v11, 96  ;;  %v69_v23 = vmul.f32 0.00390625, %v67_v19 }
  0x2a   :  { %97 = vrcp.f32 %v46_v9  ;;  %vm62_vm1 = vcmp.lt.s32.totalorder %v60_v18, 224  ;;  %v70_v27 = vmul.f32 0.00390625, %v68_v21 }
  0x2b   :  { %53 = vrot.lane.b32.xlu0 %v40_v5, %s149_s4 }
  0x33   :  { %v96_v13 = vpop.eup %95 }
  0x34   :  { %v98_v15 = vpop.eup %97  ;;  %v48_v17 = vmul.f32 %v96_v13, %v41_v12 }
  0x35   :  { %v50_v20 = vmul.f32 %v98_v15, %v42_v14 }
  0x36   :  { %v71_v24 = vmul.f32 0.001953125, %v48_v17 }
  0x37   :  { %v72_v28 = vmul.f32 0.001953125, %v50_v20 }
  0x38   :  { %v73_v33 = vadd.f32 %v71_v24, %v69_v23 }
  0x39   :  { %v74_v34 = vadd.f32 %v72_v28, %v70_v27 }
  0x99   :  { %v52_v16 = vpop.permute.xlu0 %51 }
  0x9d   :  { %v54_v22 = vpop.permute.xlu0 %53 }
  0x9e   :  { %v58_v25 = vsel %vm57_vm0, %v52_v16, %v54_v22  ;;  %v59_v26 = vsel %vm57_vm0, %v54_v22, %v52_v16 }
  0x9f   :  { %v63_v29 = vsub.f32 %v58_v25, %v39_v3  ;;  %v64_v30 = vsub.f32 %v59_v26, %v40_v5 }
  0xa1   :  { %v75_v31 = vmul.f32 %v63_v29, %v63_v29  ;;  %v66_v32 = vsel %vm62_vm1, %v64_v30, 0.0 }
  0xa2   :  { %v76_v35 = vmul.f32 %v66_v32, %v66_v32 }
  0xa3   :  { %v77_v36 = vmul.f32 0.0013392858, %v75_v31 }
  0xa4   :  { %v78_v37 = vmul.f32 0.0013392858, %v76_v35 }
  0xa5   :  { %v79_v38 = vadd.f32 %v77_v36, %v73_v33 }
  0xa6   :  { %v80_v39 = vadd.f32 %v78_v37, %v74_v34 }
  0xa8   :  { %v81_v40 = vadd.f32 %v80_v39, %v79_v38 }
  0xaa   :  { %82 = vadd.xlane.f32.xlu1 %v81_v40 }
 0x137   :  { %v83_v41 = vpop.xlane.xlu1 %82 }
 0x138   :  { %85 = vst.msk [vmem:[%s194_s2] sm:$0xff] %vm84_vm2, %v83_v41 }
 0x139   :  { %90 = vsyncpa [#allocation3], 1 }
 0x13a   :  { %91 = vsyncpa [#allocation5], 1 }

</bundles_post_ra>
